<compile_context>
chip_gen: v7x
topology: tpu7x:2x2x1
jax: 0.10.0
libtpu: 0.0.40
codegen_flags: <defaults>
</compile_context>

<pallas_src>
import functools

import jax
import jax.numpy as jnp
from jax.experimental import pallas as pl
from jax.experimental.pallas import tpu as pltpu


_PAD_NEG = -1e30              # finite large-negative pad: exp() -> 0, no NaNs
_TILE_BUDGET_BYTES = 8 * 1024 * 1024   # per logits buffer (x2 for double-buffer)


def _ce_partial_kernel(x_ref, gt_ref, out_ref, *, n_valid: int):
    # x_ref:  (TILE_N, C_pad) logits in VMEM (f32 or bf16; cast to f32 here)
    # gt_ref: (TILE_N, 1)     int32 labels in VMEM
    # out_ref:(1, 1)          f32 partial sum of per-row losses for this tile
    x = x_ref[...].astype(jnp.float32)                       # (T, C)
    labels = gt_ref[...]                                     # (T, 1)

    # numerically stable log-sum-exp
    m = jnp.max(x, axis=-1, keepdims=True)                   # (T, 1)
    z = x - m                                                # (T, C)
    lse = jnp.log(jnp.sum(jnp.exp(z), axis=-1, keepdims=True))  # (T, 1)

    # target logit via one-hot mask on x (gather-free); m folded back per row
    col_idx = jax.lax.broadcasted_iota(jnp.int32, x.shape, 1)   # (T, C)
    tgt = jnp.sum(jnp.where(col_idx == labels, x, 0.0),
                  axis=-1, keepdims=True)                       # (T, 1)

    per_row = (m + lse) - tgt                                 # -log p[gt], (T, 1)

    # mask out padded batch rows
    tile_n = x.shape[0]
    row0 = pl.program_id(0) * tile_n
    row_idx = row0 + jax.lax.broadcasted_iota(jnp.int32, (tile_n, 1), 0)
    per_row = jnp.where(row_idx < n_valid, per_row, 0.0)

    out_ref[...] = jnp.sum(per_row, keepdims=True)            # (1, 1)


def _round_up(x: int, m: int) -> int:
    return ((x + m - 1) // m) * m


def cross_entropy_loss(inputs, gt, *, tile_n=None):
    """Pallas equivalent of nn.CrossEntropyLoss()(inputs, gt) (mean reduction).

    inputs: (N, C) float logits (f32 or bf16 — streamed in their own dtype)
    gt:     (N,)   integer class indices (assumed valid, no ignore_index)
    returns scalar float32 mean loss
    """
    n, c = inputs.shape
    itemsize = jnp.dtype(inputs.dtype).itemsize

    # lane axis (classes) padded up to a multiple of 128
    c_pad = _round_up(max(c, 128), 128)

    # batch tile: multiple of 8 sublanes, logits buffer <= _TILE_BUDGET_BYTES
    if tile_n is None:
        budget_rows = max(8, (_TILE_BUDGET_BYTES // (c_pad * itemsize)) // 8 * 8)
        tile_n = int(min(512, budget_rows, _round_up(n, 8)))
    tile_n = max(8, _round_up(int(tile_n), 8))

    n_pad = _round_up(n, tile_n)
    nb = n_pad // tile_n

    x = inputs
    if (n_pad, c_pad) != (n, c):
        x = jnp.pad(x, ((0, n_pad - n), (0, c_pad - c)),
                    constant_values=_PAD_NEG)
    labels = gt.astype(jnp.int32)
    if n_pad != n:
        labels = jnp.pad(labels, (0, n_pad - n))
    labels = labels.reshape(n_pad, 1)

    # double-buffered logits + labels + outputs, plus ~1 MiB headroom
    vmem_bytes = 2 * (tile_n * c_pad * itemsize) + 2 * (tile_n * 4) + (1 << 20)
    vmem_bytes = int(min(max(vmem_bytes, 16 << 20), 48 << 20))

    partials = pl.pallas_call(
        functools.partial(_ce_partial_kernel, n_valid=n),
        out_shape=jax.ShapeDtypeStruct((nb, 1), jnp.float32),
        grid=(nb,),
        in_specs=[
            pl.BlockSpec((tile_n, c_pad), lambda i: (i, 0)),  # logits tile
            pl.BlockSpec((tile_n, 1), lambda i: (i, 0)),      # labels tile
        ],
        out_specs=pl.BlockSpec((1, 1), lambda i: (i, 0)),     # per-block partial
        compiler_params=pltpu.CompilerParams(
            dimension_semantics=("parallel",),
            vmem_limit_bytes=vmem_bytes,
        ),
    )(x, labels)

    # tiny final reduction + mean in XLA (uses the true N, not the padded one)
    return jnp.sum(partials) / jnp.float32(n)


if __name__ == "__main__":
    key = jax.random.PRNGKey(0)
    k1, k2, k3, k4, k5, k6 = jax.random.split(key, 6)

    def _ref_loss(x, y):
        logp = jax.nn.log_softmax(x.astype(jnp.float32), axis=-1)
        return -jnp.mean(logp[jnp.arange(x.shape[0]), y])

    # 1) tiny shape matching the original module test (N=8, C=32)
    x1 = jax.random.normal(k1, (8, 32), dtype=jnp.float32)
    y1 = jax.random.randint(k2, (8,), 0, 32, dtype=jnp.int32)
    l1 = jax.block_until_ready(cross_entropy_loss(x1, y1))
    r1 = _ref_loss(x1, y1)
    assert jnp.allclose(l1, r1, atol=1e-5, rtol=1e-5), (l1, r1)

    # 2) non-aligned shape + multi-block grid (forced small tile) exercising
    #    class/row padding, masking and the parallel partial-sum path.
    x2 = jax.random.normal(k3, (300, 200), dtype=jnp.float32)
    y2 = jax.random.randint(k4, (300,), 0, 200, dtype=jnp.int32)
    l2 = jax.block_until_ready(cross_entropy_loss(x2, y2, tile_n=64))
    r2 = _ref_loss(x2, y2)
    assert jnp.allclose(l2, r2, atol=1e-5, rtol=1e-5), (l2, r2)

    # 3) bf16 logits streamed as bf16 (f32 math inside the kernel)
    x3 = jax.random.normal(k5, (64, 128), dtype=jnp.float32).astype(jnp.bfloat16)
    y3 = jax.random.randint(k6, (64,), 0, 128, dtype=jnp.int32)
    l3 = jax.block_until_ready(cross_entropy_loss(x3, y3))
    r3 = _ref_loss(x3, y3)
    assert jnp.allclose(l3, r3, atol=2e-5, rtol=2e-5), (l3, r3)

    print("KERNEL_OK")
</pallas_src>

<mosaic_0001>
module attributes {stable_mosaic.version = 11 : i64} {
  func.func @_ce_partial_kernel(%arg0: i32, %arg1: memref<8x128xf32, #tpu.memory_space<vmem>>, %arg2: memref<8x1xi32, #tpu.memory_space<vmem>>, %arg3: memref<1x1xf32, #tpu.memory_space<vmem>>) attributes {dimension_semantics = [#tpu.dimension_semantics<parallel>], iteration_bounds = array<i64: 1>, scalar_prefetch = 0 : i64, scratch_operands = 0 : i64, tpu.core_type = #tpu.core_type<tc>, window_params = [{transform_indices = @transform_0, window_bounds = array<i64: 8, 128>}, {transform_indices = @transform_1, window_bounds = array<i64: 8, 1>}, {transform_indices = @transform_2, window_bounds = array<i64: 1, 1>}]} {
    %c0 = arith.constant 0 : index
    %c0_0 = arith.constant 0 : index
    %0 = vector.load %arg1[%c0, %c0_0] : memref<8x128xf32, #tpu.memory_space<vmem>>, vector<8x128xf32>
    %c0_1 = arith.constant 0 : index
    %c0_2 = arith.constant 0 : index
    %1 = vector.load %arg2[%c0_1, %c0_2] : memref<8x1xi32, #tpu.memory_space<vmem>>, vector<8x1xi32>
    %cst = arith.constant dense<0xFF800000> : vector<8xf32>
    %2 = vector.multi_reduction <maximumf>, %0, %cst [1] : vector<8x128xf32> to vector<8xf32>
    %3 = vector.shape_cast %2 : vector<8xf32> to vector<8x1xf32>
    %4 = vector.broadcast %3 : vector<8x1xf32> to vector<8x128xf32>
    %5 = arith.subf %0, %4 : vector<8x128xf32>
    %6 = math.exp %5 : vector<8x128xf32>
    %cst_3 = arith.constant dense<0.000000e+00> : vector<8xf32>
    %7 = vector.multi_reduction <add>, %6, %cst_3 [1] : vector<8x128xf32> to vector<8xf32>
    %8 = vector.shape_cast %7 : vector<8xf32> to vector<8x1xf32>
    %9 = math.log %8 : vector<8x1xf32>
    %10 = tpu.iota {dimensions = array<i32: 1>} : vector<8x128xi32>
    %11 = vector.broadcast %1 : vector<8x1xi32> to vector<8x128xi32>
    %12 = arith.cmpi eq, %10, %11 : vector<8x128xi32>
    %cst_4 = arith.constant 0.000000e+00 : f32
    %13 = vector.broadcast %cst_4 : f32 to vector<8x128xf32>
    %14 = arith.select %12, %0, %13 : vector<8x128xi1>, vector<8x128xf32>
    %cst_5 = arith.constant dense<0.000000e+00> : vector<8xf32>
    %15 = vector.multi_reduction <add>, %14, %cst_5 [1] : vector<8x128xf32> to vector<8xf32>
    %16 = vector.shape_cast %15 : vector<8xf32> to vector<8x1xf32>
    %17 = arith.addf %3, %9 : vector<8x1xf32>
    %18 = arith.subf %17, %16 : vector<8x1xf32>
    %c8_i32 = arith.constant 8 : i32
    %19 = arith.muli %arg0, %c8_i32 : i32
    %20 = tpu.iota {dimensions = array<i32: 0>} : vector<8x1xi32>
    %21 = vector.broadcast %19 : i32 to vector<8x1xi32>
    %22 = arith.addi %21, %20 : vector<8x1xi32>
    %c8_i32_6 = arith.constant 8 : i32
    %23 = vector.broadcast %c8_i32_6 : i32 to vector<8x1xi32>
    %24 = arith.cmpi slt, %22, %23 : vector<8x1xi32>
    %cst_7 = arith.constant 0.000000e+00 : f32
    %25 = vector.broadcast %cst_7 : f32 to vector<8x1xf32>
    %26 = arith.select %24, %18, %25 : vector<8x1xi1>, vector<8x1xf32>
    %27 = vector.shape_cast %26 : vector<8x1xf32> to vector<1x8x1xf32>
    %cst_8 = arith.constant dense<0.000000e+00> : vector<1xf32>
    %28 = vector.multi_reduction <add>, %27, %cst_8 [1, 2] : vector<1x8x1xf32> to vector<1xf32>
    %29 = vector.shape_cast %28 : vector<1xf32> to vector<1x1x1xf32>
    %30 = vector.extract %29[0, 0, 0] : f32 from vector<1x1x1xf32>
    %31 = vector.broadcast %30 : f32 to vector<1x1xf32>
    %c0_9 = arith.constant 0 : index
    %c0_10 = arith.constant 0 : index
    %32 = vector.load %arg3[%c0_9, %c0_10] : memref<1x1xf32, #tpu.memory_space<vmem>>, vector<1x1xf32>
    tpu.vector_store %arg3[%c0_9, %c0_10], %31 {strides = array<i32>} : memref<1x1xf32, #tpu.memory_space<vmem>>, vector<1x1xf32>,
    return
  }
  func.func @transform_0(%arg0: i32) -> (i32, i32) {
    %c0_i32 = arith.constant 0 : i32
    %c0_i32_0 = arith.constant 0 : i32
    return %arg0, %c0_i32 : i32, i32
  }
  func.func @transform_1(%arg0: i32) -> (i32, i32) {
    %c0_i32 = arith.constant 0 : i32
    %c0_i32_0 = arith.constant 0 : i32
    return %arg0, %c0_i32 : i32, i32
  }
  func.func @transform_2(%arg0: i32) -> (i32, i32) {
    %c0_i32 = arith.constant 0 : i32
    %c0_i32_0 = arith.constant 0 : i32
    return %arg0, %c0_i32 : i32, i32
  }
}

</mosaic_0001>

<bundles_post_ra>
// kernel: tpu_custom_call.1
= control target key start
LH: loop header
LB: loop body
LE: loop exit
PB: predicated region body
PF: predicated region fallthrough
CT: control target
= control target key end

     0   :  { %s137_s0 = inlined_call_operand.vmem [shape: f32[8,128], index: 0, kind: input, shape index: {}]   ;;  %s138_s1 = inlined_call_operand.vmem [shape: s32[8,1], index: 1, kind: input, shape index: {}]   ;;  %s139_s2 = inlined_call_operand.hbm [shape: f32[1,1], index: 2, kind: output, shape index: {}]  }
   0x1   :  { %v12_v0 = vld [vmem:[%s137_s0] sm:$0xff] }
   0x2   :  { %7 = vsyncpa [#allocation3], 0  ;;  %14 = vmax.xlane.f32.xlu0 %v12_v0  ;;  %v102_v1 = vmov 0   ;;  %v13_v2 = vld [vmem:[%s138_s1] sm:$0xff]  ;;  %v23_v6 = vlaneseq  ;;  %vm41_vm1 = vcmask 7168   ;;  %s103_s0 = smov [#allocation2]  }
   0x3   :  { %73 = vset.pattern.permute.xlu0 %v102_v1  ;;  %s61_s1 = sshll.u32 %s103_s0, 4  ;;  %vm53_vm2 = vcmask 0   ;;  %s62_s1 = int_to_ptr.vmem [resolvable:$true] %s61_s1 }
   0x4   :  { %v24_v7 = vand.u32 127, %v23_v6  ;;  %s78_s14 = scalar_lea.vmem %s62_s1, 16  ;;  %s82_s15 = scalar_lea.vmem %s62_s1, 32 }
   0x5   :  { %p79_p0 = scmp.ne.s32.totalorder %s62_s1, %s78_s14  ;;  %p83_p1 = scmp.lt.s32.totalorder %s62_s1, %s62_s1 }
   0x6   :  { %p84_p2 = scmp.lt.s32.totalorder %s82_s15, %s78_s14 }
   0x8   :  { %p85_p3 = por %p84_p2, %p83_p1 }
   0xa   :  { %p86_p4 = pnand %p85_p3, %p79_p0 }
  0x18   :  { %26 = vperm.xlu0 %73, %v13_v2  }
  0x8f   :  { %v15_v3 = vpop.xlane.xlu0 %14 }
  0x90   :  { %v16_v4 = vsub.f32 %v12_v0, %v15_v3 }
  0x92   :  { %v17_v5 = vmul.f32 1.442695, %v16_v4 }
  0x94   :  { %74 = vpow2.f32 %v17_v5 }
  0x97   :  { %v27_v8 = vpop.permute.xlu0 %26 }
  0x98   :  { %vm28_vm0 = vcmp.eq.s32.totalorder %v24_v7, %v27_v8 }
  0x99   :  { %v29_v10 = vsel %vm28_vm0, %v12_v0, 0.0 }
  0x9e   :  { %v75_v9 = vpop.eup %74 }
  0x9f   :  { %19 = vadd.xlane.f32.xlu1 %v75_v9 }
  0xa3   :  { %30 = vadd.xlane.f32.xlu1 %v29_v10 }
 0x12c   :  { %v20_v11 = vpop.xlane.xlu1 %19 }
 0x12d   :  { %76 = vlog2.f32 %v20_v11 }
 0x130   :  { %v31_v14 = vpop.xlane.xlu1 %30 }
 0x137   :  { %v77_v12 = vpop.eup %76 }
 0x138   :  { %v22_v13 = vmul.f32 0.6931472, %v77_v12 }
 0x13a   :  { %v32_v15 = vadd.f32 %v22_v13, %v15_v3 }
 0x13c   :  { %v33_v16 = vsub.f32 %v32_v15, %v31_v14 }
 0x13e   :  { %v42_v17 = vsel %vm41_vm1, %v33_v16, 0.0 }
 0x13f   :  { %43 = vadd.xlane.f32.xlu1 %v42_v17 }
 0x1cc   :  { %v44_v18 = vpop.xlane.xlu1 %43 }
 0x1cd   :  { %v45_v19 = vrot.slane %v44_v18, 4 }
 0x1cf   :  { %v46_v20 = vadd.f32 %v45_v19, %v44_v18 }
 0x1d1   :  { %v47_v21 = vrot.slane %v46_v20, 2 }
 0x1d3   :  { %v48_v22 = vadd.f32 %v47_v21, %v46_v20 }
 0x1d5   :  { %v49_v23 = vrot.slane %v48_v22, 1 }
 0x1d7   :  { %v50_v24 = vadd.f32 %v49_v23, %v48_v22 }
 0x1d9   :  { %69 = vpush %v50_v24 }
 0x20a   :  { %s70_s13 = spop %69 }
 0x20b   :  { %v52_v25 = vstv %s70_s13 }
 0x20c   :  { %54 = vst.msk [vmem:[#allocation2] sm:$0x1] %vm53_vm2, %v52_v25 }
 0x20d   :  { %89 = shalt.err (!%p86_p4)
}
 0x20e   :  { %s90_s18 = scalar_lea.hbm %s139_s2, 16 }
 0x20f   :  { %p91_p5 = scmp.ne.s32.totalorder %s139_s2, %s90_s18  ;;  %p94_p6 = scmp.lt.u32.totalorder %s90_s18, %s139_s2 }
 0x211   :  { %p96_p7 = pnand %p94_p6, %p91_p5 }
 0x213   :  { %99 = shalt.err (!%p96_p7)
}
 0x214   :  { %64 = dma.vmem_to_hbm [thread:$0]  %s62_s1, 16, %s139_s2, [#allocation3]  }
 0x215   :  { %100 = dma.done.wait [#allocation3], 16  }
 0x216   :  { %101 = vsyncadd [#allocation3], 4294967280 }
 0x217   :  { %68 = vsyncpa [#allocation3], 1 }

</bundles_post_ra>
